<compile_context>
chip_gen: v7x
topology: tpu7x:2x2x1
jax: 0.10.0
libtpu: 0.0.40
codegen_flags: <defaults>
</compile_context>

<pallas_src>
import jax
import jax.numpy as jnp
from jax import lax
from jax.experimental import pallas as pl
from jax.experimental.pallas import tpu as pltpu


def _round_up(x, m):
    return ((x + m - 1) // m) * m


def rnn_forward_kernel(tok_ref,     # (L*Bp, 1) int32, time-major: row = t*Bp + b
                       eproj_ref,   # (Vp, D)  bf16 = emb_padded @ W_ih^T  (precomposed)
                       brnn_ref,    # (1, D)   f32  = b_ih + b_hh
                       whh_t_ref,   # (D, D)   bf16 = W_hh^T
                       wcls_t_ref,  # (D, L)   bf16 = W_cls^T
                       bcls_ref,    # (1, L)   f32  = b_cls
                       out_ref):    # (Bp, L)  f32 softmax probabilities
    Bp, L = out_ref.shape
    Vp, D = eproj_ref.shape

    # ---- fused embedding gather + input projection: ONE bf16 MXU matmul -----
    tok = tok_ref[...]                                             # (L*Bp, 1)
    onehot = (tok == lax.broadcasted_iota(jnp.int32, (L * Bp, Vp), 1)
              ).astype(jnp.bfloat16)                               # (L*Bp, Vp), 0/1 exact in bf16
    xproj = (jnp.dot(onehot, eproj_ref[...],
                     preferred_element_type=jnp.float32)           # f32 accumulation
             + brnn_ref[...])                                      # (L*Bp, D) f32

    # ---- recurrence, fully unrolled (L is compile-time static) --------------
    whh_t = whh_t_ref[...]                                         # (D, D) bf16, VMEM-resident
    # h_0 = 0  =>  h_1 = tanh(xproj[0])
    h = jnp.tanh(xproj[0:Bp, :])                                   # (Bp, D) f32
    for t in range(1, L):                                          # static unroll
        x_t = xproj[t * Bp:(t + 1) * Bp, :]                        # static, tile-aligned slice
        h = jnp.tanh(x_t + jnp.dot(h.astype(jnp.bfloat16), whh_t,
                                   preferred_element_type=jnp.float32))

    # ---- classifier + softmax (reciprocal on the EUP) ------------------------
    logits = (jnp.dot(h.astype(jnp.bfloat16), wcls_t_ref[...],
                      preferred_element_type=jnp.float32)
              + bcls_ref[...])                                     # (Bp, L) f32
    m = jnp.max(logits, axis=1, keepdims=True)
    e = jnp.exp(logits - m)
    denom = jnp.sum(e, axis=1, keepdims=True)
    out_ref[...] = e * pl.reciprocal(denom, approx=True)


def preprocess_params(params):
    """One-time parameter preprocessing (keep OUT of the per-call hot path)."""
    emb = params["embedding"].astype(jnp.float32)                  # (V, D)
    V, D = emb.shape
    L = params["b_cls"].shape[0]
    Vp = _round_up(V, 8)                                           # aligned one-hot contraction
    emb_p = jnp.pad(emb, ((0, Vp - V), (0, 0)))                    # (Vp, D)
    # Precompose gather + input projection in f32, then cast once to bf16.
    eproj = emb_p @ params["w_ih"].astype(jnp.float32).T           # (Vp, D)
    return {
        "eproj": eproj.astype(jnp.bfloat16),                                        # (Vp, D)
        "brnn": (params["b_ih"] + params["b_hh"]).astype(jnp.float32).reshape(1, D),
        "whh_t": params["w_hh"].astype(jnp.float32).T.astype(jnp.bfloat16),         # (D, D)
        "wcls_t": params["w_cls"].astype(jnp.float32).T.astype(jnp.bfloat16),       # (D, L)
        "bcls": params["b_cls"].astype(jnp.float32).reshape(1, L),
    }


@jax.jit
def rnn_model_forward(x_tokens, prep):
    """x_tokens: (B, L) int32 token ids.  prep: output of preprocess_params.
    Returns (B, L) softmax probabilities."""
    B, L = x_tokens.shape
    Vp, D = prep["eproj"].shape
    Bp = _round_up(B, 8)                                           # sublane-dense batch

    # Only per-call glue: pad + time-major flatten of the tiny token tensor.
    tok_p = jnp.pad(x_tokens.astype(jnp.int32), ((0, Bp - B), (0, 0)))   # pad with token 0
    tok_tm = jnp.transpose(tok_p).reshape(L * Bp, 1)                      # time-major flat

    vmem = pl.BlockSpec(memory_space=pltpu.MemorySpace.VMEM)

    flops = 2 * (L * Bp * Vp * D        # fused gather+projection matmul
                 + (L - 1) * Bp * D * D  # recurrence h @ W_hh^T
                 + Bp * D * L)           # classifier
    transcendentals = L * Bp * D + Bp * L + Bp    # tanh + exp + reciprocal
    bytes_accessed = (4 * (tok_tm.size + D + L + Bp * L + L * Bp * D)
                      + 2 * (Vp * D + D * D + D * L))

    out = pl.pallas_call(
        rnn_forward_kernel,
        out_shape=jax.ShapeDtypeStruct((Bp, L), jnp.float32),
        in_specs=[vmem] * 6,
        out_specs=vmem,
        compiler_params=pltpu.CompilerParams(vmem_limit_bytes=16 * 1024 * 1024),
        cost_estimate=pl.CostEstimate(flops=flops,
                                      transcendentals=transcendentals,
                                      bytes_accessed=bytes_accessed),
    )(tok_tm, prep["eproj"], prep["brnn"], prep["whh_t"], prep["wcls_t"],
      prep["bcls"])

    return out[:B]                               # drop batch padding rows


def rnn_model_reference(x_tokens, params):
    """Pure-JAX f32 reference matching the PyTorch forward (inference path)."""
    emb = jnp.take(params["embedding"], x_tokens, axis=0)     # (B, L, D)
    B, L, D = emb.shape
    h = jnp.zeros((B, D), jnp.float32)
    for t in range(L):
        h = jnp.tanh(emb[:, t, :] @ params["w_ih"].T + params["b_ih"]
                     + h @ params["w_hh"].T + params["b_hh"])
    logits = h @ params["w_cls"].T + params["b_cls"]
    return jax.nn.softmax(logits, axis=1)


def init_params(key, vocab_size, vector_dim, sentence_length):
    k_emb, k_wih, k_whh, k_bih, k_bhh, k_wc, k_bc = jax.random.split(key, 7)
    D, L, V = vector_dim, sentence_length, vocab_size
    emb = jax.random.normal(k_emb, (V, D), jnp.float32) * 0.1
    emb = emb.at[0].set(0.0)                               # padding_idx=0
    s = 1.0 / jnp.sqrt(jnp.float32(D))
    return {
        "embedding": emb,
        "w_ih": jax.random.uniform(k_wih, (D, D), jnp.float32, -s, s),
        "w_hh": jax.random.uniform(k_whh, (D, D), jnp.float32, -s, s),
        "b_ih": jax.random.uniform(k_bih, (D,), jnp.float32, -s, s),
        "b_hh": jax.random.uniform(k_bhh, (D,), jnp.float32, -s, s),
        "w_cls": jax.random.uniform(k_wc, (L, D), jnp.float32, -s, s),
        "b_cls": jax.random.uniform(k_bc, (L,), jnp.float32, -s, s),
    }


if __name__ == "__main__":
    VECTOR_DIM = 32       # vector_dim
    SENT_LEN = 8          # sentence_length (= seq len = num classes)
    VOCAB_SIZE = 30       # len(vocab)
    BATCH = 4

    key = jax.random.PRNGKey(0)
    k_params, k_tokens = jax.random.split(key)
    params = init_params(k_params, VOCAB_SIZE, VECTOR_DIM, SENT_LEN)
    x = jax.random.randint(k_tokens, (BATCH, SENT_LEN), 0, VOCAB_SIZE,
                           dtype=jnp.int32)

    prep = jax.tree_util.tree_map(jax.block_until_ready,
                                  preprocess_params(params))   # one-time, off hot path

    y_pred = rnn_model_forward(x, prep)
    y_pred = jax.block_until_ready(y_pred)

    y_ref = rnn_model_reference(x, params)

    assert y_pred.shape == (BATCH, SENT_LEN)
    # softmax rows sum to ~1 (approx-reciprocal epilogue)
    assert jnp.allclose(jnp.sum(y_pred, axis=1), 1.0, atol=2e-2)
    assert jnp.allclose(y_pred, y_ref, atol=2e-2), "kernel != reference"
    # TODO(synk): training branch (cross_entropy loss when y is given) not implemented.
    print("KERNEL_OK")
</pallas_src>

<mosaic_0001>
module attributes {stable_mosaic.version = 11 : i64} {
  func.func @rnn_forward_kernel(%arg0: memref<64x1xi32, #tpu.memory_space<vmem>>, %arg1: memref<32x32xbf16, #tpu.memory_space<vmem>>, %arg2: memref<1x32xf32, #tpu.memory_space<vmem>>, %arg3: memref<32x32xbf16, #tpu.memory_space<vmem>>, %arg4: memref<32x8xbf16, #tpu.memory_space<vmem>>, %arg5: memref<1x8xf32, #tpu.memory_space<vmem>>, %arg6: memref<8x8xf32, #tpu.memory_space<vmem>>) attributes {dimension_semantics = [], scalar_prefetch = 0 : i64, scratch_operands = 0 : i64, tpu.core_type = #tpu.core_type<tc>} {
    %c0 = arith.constant 0 : index
    %c0_0 = arith.constant 0 : index
    %0 = vector.load %arg0[%c0, %c0_0] : memref<64x1xi32, #tpu.memory_space<vmem>>, vector<64x1xi32>
    %1 = tpu.iota {dimensions = array<i32: 1>} : vector<64x32xi32>
    %2 = vector.broadcast %0 : vector<64x1xi32> to vector<64x32xi32>
    %3 = arith.cmpi eq, %2, %1 : vector<64x32xi32>
    %4 = arith.extui %3 : vector<64x32xi1> to vector<64x32xi32>
    %5 = arith.sitofp %4 : vector<64x32xi32> to vector<64x32xf32>
    %6 = arith.truncf %5 : vector<64x32xf32> to vector<64x32xbf16>
    %c0_1 = arith.constant 0 : index
    %c0_2 = arith.constant 0 : index
    %7 = vector.load %arg1[%c0_1, %c0_2] : memref<32x32xbf16, #tpu.memory_space<vmem>>, vector<32x32xbf16>
    %cst = arith.constant dense<0.000000e+00> : vector<64x32xf32>
    %8 = tpu.matmul %6, %7, %cst {dimension_numbers = #tpu.dot_dimension_numbers<[1], [0], [0], [1], [0, 0, 1, 1], [], []>} : vector<64x32xbf16>, vector<32x32xbf16>, vector<64x32xf32> -> vector<64x32xf32>
    %c0_3 = arith.constant 0 : index
    %c0_4 = arith.constant 0 : index
    %9 = vector.load %arg2[%c0_3, %c0_4] : memref<1x32xf32, #tpu.memory_space<vmem>>, vector<1x32xf32>
    %10 = vector.broadcast %9 : vector<1x32xf32> to vector<64x32xf32>
    %11 = arith.addf %8, %10 : vector<64x32xf32>
    %c0_5 = arith.constant 0 : index
    %c0_6 = arith.constant 0 : index
    %12 = vector.load %arg3[%c0_5, %c0_6] : memref<32x32xbf16, #tpu.memory_space<vmem>>, vector<32x32xbf16>
    %13 = vector.extract_strided_slice %11 {offsets = [0, 0], sizes = [8, 32], strides = [1, 1]} : vector<64x32xf32> to vector<8x32xf32>
    %14 = math.tanh %13 : vector<8x32xf32>
    %15 = vector.extract_strided_slice %11 {offsets = [8, 0], sizes = [8, 32], strides = [1, 1]} : vector<64x32xf32> to vector<8x32xf32>
    %16 = arith.truncf %14 : vector<8x32xf32> to vector<8x32xbf16>
    %cst_7 = arith.constant dense<0.000000e+00> : vector<8x32xf32>
    %17 = tpu.matmul %16, %12, %cst_7 {dimension_numbers = #tpu.dot_dimension_numbers<[1], [0], [0], [1], [0, 0, 1, 1], [], []>} : vector<8x32xbf16>, vector<32x32xbf16>, vector<8x32xf32> -> vector<8x32xf32>
    %18 = arith.addf %15, %17 : vector<8x32xf32>
    %19 = math.tanh %18 : vector<8x32xf32>
    %20 = vector.extract_strided_slice %11 {offsets = [16, 0], sizes = [8, 32], strides = [1, 1]} : vector<64x32xf32> to vector<8x32xf32>
    %21 = arith.truncf %19 : vector<8x32xf32> to vector<8x32xbf16>
    %cst_8 = arith.constant dense<0.000000e+00> : vector<8x32xf32>
    %22 = tpu.matmul %21, %12, %cst_8 {dimension_numbers = #tpu.dot_dimension_numbers<[1], [0], [0], [1], [0, 0, 1, 1], [], []>} : vector<8x32xbf16>, vector<32x32xbf16>, vector<8x32xf32> -> vector<8x32xf32>
    %23 = arith.addf %20, %22 : vector<8x32xf32>
    %24 = math.tanh %23 : vector<8x32xf32>
    %25 = vector.extract_strided_slice %11 {offsets = [24, 0], sizes = [8, 32], strides = [1, 1]} : vector<64x32xf32> to vector<8x32xf32>
    %26 = arith.truncf %24 : vector<8x32xf32> to vector<8x32xbf16>
    %cst_9 = arith.constant dense<0.000000e+00> : vector<8x32xf32>
    %27 = tpu.matmul %26, %12, %cst_9 {dimension_numbers = #tpu.dot_dimension_numbers<[1], [0], [0], [1], [0, 0, 1, 1], [], []>} : vector<8x32xbf16>, vector<32x32xbf16>, vector<8x32xf32> -> vector<8x32xf32>
    %28 = arith.addf %25, %27 : vector<8x32xf32>
    %29 = math.tanh %28 : vector<8x32xf32>
    %30 = vector.extract_strided_slice %11 {offsets = [32, 0], sizes = [8, 32], strides = [1, 1]} : vector<64x32xf32> to vector<8x32xf32>
    %31 = arith.truncf %29 : vector<8x32xf32> to vector<8x32xbf16>
    %cst_10 = arith.constant dense<0.000000e+00> : vector<8x32xf32>
    %32 = tpu.matmul %31, %12, %cst_10 {dimension_numbers = #tpu.dot_dimension_numbers<[1], [0], [0], [1], [0, 0, 1, 1], [], []>} : vector<8x32xbf16>, vector<32x32xbf16>, vector<8x32xf32> -> vector<8x32xf32>
    %33 = arith.addf %30, %32 : vector<8x32xf32>
    %34 = math.tanh %33 : vector<8x32xf32>
    %35 = vector.extract_strided_slice %11 {offsets = [40, 0], sizes = [8, 32], strides = [1, 1]} : vector<64x32xf32> to vector<8x32xf32>
    %36 = arith.truncf %34 : vector<8x32xf32> to vector<8x32xbf16>
    %cst_11 = arith.constant dense<0.000000e+00> : vector<8x32xf32>
    %37 = tpu.matmul %36, %12, %cst_11 {dimension_numbers = #tpu.dot_dimension_numbers<[1], [0], [0], [1], [0, 0, 1, 1], [], []>} : vector<8x32xbf16>, vector<32x32xbf16>, vector<8x32xf32> -> vector<8x32xf32>
    %38 = arith.addf %35, %37 : vector<8x32xf32>
    %39 = math.tanh %38 : vector<8x32xf32>
    %40 = vector.extract_strided_slice %11 {offsets = [48, 0], sizes = [8, 32], strides = [1, 1]} : vector<64x32xf32> to vector<8x32xf32>
    %41 = arith.truncf %39 : vector<8x32xf32> to vector<8x32xbf16>
    %cst_12 = arith.constant dense<0.000000e+00> : vector<8x32xf32>
    %42 = tpu.matmul %41, %12, %cst_12 {dimension_numbers = #tpu.dot_dimension_numbers<[1], [0], [0], [1], [0, 0, 1, 1], [], []>} : vector<8x32xbf16>, vector<32x32xbf16>, vector<8x32xf32> -> vector<8x32xf32>
    %43 = arith.addf %40, %42 : vector<8x32xf32>
    %44 = math.tanh %43 : vector<8x32xf32>
    %45 = vector.extract_strided_slice %11 {offsets = [56, 0], sizes = [8, 32], strides = [1, 1]} : vector<64x32xf32> to vector<8x32xf32>
    %46 = arith.truncf %44 : vector<8x32xf32> to vector<8x32xbf16>
    %cst_13 = arith.constant dense<0.000000e+00> : vector<8x32xf32>
    %47 = tpu.matmul %46, %12, %cst_13 {dimension_numbers = #tpu.dot_dimension_numbers<[1], [0], [0], [1], [0, 0, 1, 1], [], []>} : vector<8x32xbf16>, vector<32x32xbf16>, vector<8x32xf32> -> vector<8x32xf32>
    %48 = arith.addf %45, %47 : vector<8x32xf32>
    %49 = math.tanh %48 : vector<8x32xf32>
    %50 = arith.truncf %49 : vector<8x32xf32> to vector<8x32xbf16>
    %c0_14 = arith.constant 0 : index
    %c0_15 = arith.constant 0 : index
    %51 = vector.load %arg4[%c0_14, %c0_15] : memref<32x8xbf16, #tpu.memory_space<vmem>>, vector<32x8xbf16>
    %cst_16 = arith.constant dense<0.000000e+00> : vector<8x8xf32>
    %52 = tpu.matmul %50, %51, %cst_16 {dimension_numbers = #tpu.dot_dimension_numbers<[1], [0], [0], [1], [0, 0, 1, 1], [], []>} : vector<8x32xbf16>, vector<32x8xbf16>, vector<8x8xf32> -> vector<8x8xf32>
    %c0_17 = arith.constant 0 : index
    %c0_18 = arith.constant 0 : index
    %53 = vector.load %arg5[%c0_17, %c0_18] : memref<1x8xf32, #tpu.memory_space<vmem>>, vector<1x8xf32>
    %54 = vector.broadcast %53 : vector<1x8xf32> to vector<8x8xf32>
    %55 = arith.addf %52, %54 : vector<8x8xf32>
    %cst_19 = arith.constant dense<0xFF800000> : vector<8xf32>
    %56 = vector.multi_reduction <maximumf>, %55, %cst_19 [1] : vector<8x8xf32> to vector<8xf32>
    %57 = vector.shape_cast %56 : vector<8xf32> to vector<8x1xf32>
    %58 = vector.broadcast %57 : vector<8x1xf32> to vector<8x8xf32>
    %59 = arith.subf %55, %58 : vector<8x8xf32>
    %60 = math.exp %59 : vector<8x8xf32>
    %cst_20 = arith.constant dense<0.000000e+00> : vector<8xf32>
    %61 = vector.multi_reduction <add>, %60, %cst_20 [1] : vector<8x8xf32> to vector<8xf32>
    %62 = vector.shape_cast %61 : vector<8xf32> to vector<8x1xf32>
    %63 = tpu.reciprocal %62 {approx = true} : vector<8x1xf32> -> vector<8x1xf32>
    %64 = vector.broadcast %63 : vector<8x1xf32> to vector<8x8xf32>
    %65 = arith.mulf %60, %64 : vector<8x8xf32>
    %c0_21 = arith.constant 0 : index
    %c0_22 = arith.constant 0 : index
    %66 = vector.load %arg6[%c0_21, %c0_22] : memref<8x8xf32, #tpu.memory_space<vmem>>, vector<8x8xf32>
    tpu.vector_store %arg6[%c0_21, %c0_22], %65 {strides = array<i32>} : memref<8x8xf32, #tpu.memory_space<vmem>>, vector<8x8xf32>,
    return
  }
}

</mosaic_0001>

<bundles_post_ra>
// kernel: rnn_model_forward.1
= control target key start
LH: loop header
LB: loop body
LE: loop exit
PB: predicated region body
PF: predicated region fallthrough
CT: control target
= control target key end

     0   :  { %v775_v0 = vmov 0   ;;  %v776_v5 = vmov 0.0   ;;  %v32_v12 = vlaneseq  ;;  %vm109_vm4 = vcmask 261120   ;;  %s946_s0 = inlined_call_operand.vmem [shape: s32[64,1], index: 0, kind: input, shape index: {}]   ;;  %s947_s1 = inlined_call_operand.vmem [shape: bf16[32,32], index: 1, kind: input, shape index: {}]   ;;  %s948_s3 = inlined_call_operand.vmem [shape: bf16[32,32], index: 3, kind: input, shape index: {}]   ;;  %s949_s2 = inlined_call_operand.vmem [shape: f32[1,32], index: 2, kind: input, shape index: {}]   ;;  %s950_s4 = inlined_call_operand.vmem [shape: bf16[32,8], index: 4, kind: input, shape index: {}]   ;;  %s951_s5 = inlined_call_operand.vmem [shape: f32[1,8], index: 5, kind: input, shape index: {}]   ;;  %s952_s6 = inlined_call_operand.vmem [shape: f32[8,8], index: 6, kind: output, shape index: {}]  }
   0x1   :  { %748 = vset.pattern.permute.xlu1 %v775_v0  ;;  %747 = vset.pattern.permute.xlu0 %v775_v0  ;;  %v26_v1 = vld [vmem:[%s946_s0 + $0x10] sm:$0xff]  ;;  %v24_v2 = vld [vmem:[%s946_s0] sm:$0xff]  ;;  %v27_v3 = vld [vmem:[%s946_s0 + $0x18] sm:$0xff]  ;;  %vm777_vm9 = vmmov 0   ;;  %vm593_vm10 = vcmask 64512  }
   0x2   :  { %41 = vperm.xlu1 %748, %v26_v1   ;;  %35 = vperm.xlu0 %747, %v24_v2   ;;  %v25_v4 = vld [vmem:[%s946_s0 + $0x8] sm:$0xff]  ;;  %v749_v6 = vld [vmem:[%s947_s1] sm:$0xff]   ;;  %v31_v10 = vld [vmem:[%s946_s0 + $0x38] sm:$0xff]  ;;  %v33_v13 = vand.u32 127, %v32_v12 }
   0x3   :  { %680 = vmatprep.subr.bf16.mxu1 %v776_v5  ;;  %v750_v7 = vld [vmem:[%s947_s1 + $0x8] sm:$0xff]   ;;  %v28_v9 = vld [vmem:[%s946_s0 + $0x20] sm:$0xff]  ;;  %668 = vmatprep.subr.bf16.mxu0 %v749_v6  ;;  %v30_v11 = vld [vmem:[%s946_s0 + $0x30] sm:$0xff] }
   0x4   :  { %v29_v8 = vld [vmem:[%s946_s0 + $0x28] sm:$0xff]  ;;  %669 = vmatpush3.bf16.msra.mxu0 %v749_v6  ;;  %v860_v34 = vld [vmem:[%s948_s3] sm:$0xff]   ;;  %684 = vmatprep.mubr.msk.bf16.mxu1 %vm777_vm9, %v776_v5 }
   0x5   :  { %670 = vmatprep.subr.bf16.mxu0 %v750_v7  ;;  %681 = vmatpush3.bf16.msra.mxu1 %v860_v34  ;;  %v869_v35 = vld [vmem:[%s948_s3 + $0x8] sm:$0xff]   ;;  %v618_v36 = vld [vmem:[%s949_s2] ss:$0 sm:$0xff] }
   0x6   :  { %44 = vperm.xlu1 %748, %v27_v3   ;;  %38 = vperm.xlu0 %747, %v25_v4  }
   0x7   :  { %682 = vmatprep.subr.bf16.mxu1 %v776_v5 }
   0x8   :  { %671 = vmatpush3.bf16.msra.mxu0 %v750_v7 }
   0x9   :  { %696 = vmatprep.subr.bf16.mxu0 %v776_v5  ;;  %683 = vmatpush3.bf16.msra.mxu1 %v869_v35 }
   0xa   :  { %50 = vperm.xlu1 %748, %v29_v8   ;;  %47 = vperm.xlu0 %747, %v28_v9  }
   0xb   :  { %688 = vmatprep.subr.bf16.mxu1 %v776_v5 }
   0xe   :  { %56 = vperm.xlu1 %748, %v31_v10   ;;  %53 = vperm.xlu0 %747, %v30_v11  }
  0x81   :  { %v42_v14 = vpop.permute.xlu1 %41  ;;  %v36_v15 = vpop.permute.xlu0 %35 }
  0x82   :  { %vm60_vm0 = vcmp.eq.s32.totalorder %v42_v14, %v33_v13  ;;  %vm58_vm1 = vcmp.eq.s32.totalorder %v36_v15, %v33_v13 }
  0x83   :  { %v612_v18 = vsel %vm60_vm0, 1.0, %v776_v5  ;;  %v610_v19 = vsel %vm58_vm1, 1.0, %v776_v5 }
  0x85   :  { %v45_v16 = vpop.permute.xlu1 %44  ;;  %v39_v17 = vpop.permute.xlu0 %38 }
  0x86   :  { %vm61_vm2 = vcmp.eq.s32.totalorder %v45_v16, %v33_v13  ;;  %vm59_vm3 = vcmp.eq.s32.totalorder %v39_v17, %v33_v13 }
  0x87   :  { %v613_v20 = vsel %vm61_vm2, 1.0, %v776_v5  ;;  %v611_v21 = vsel %vm59_vm3, 1.0, %v776_v5 }
  0x88   :  { %v83_v22 = vpack.c.bf16 %v613_v20, %v612_v18  ;;  %v82_v23 = vpack.c.bf16 %v611_v21, %v610_v19 }
  0x89   :  { %v51_v24 = vpop.permute.xlu1 %50  ;;  %v48_v25 = vpop.permute.xlu0 %47 }
  0x8a   :  { %vm63_vm5 = vcmp.eq.s32.totalorder %v51_v24, %v33_v13  ;;  %vm62_vm6 = vcmp.eq.s32.totalorder %v48_v25, %v33_v13  ;;  %672 = vmatprep.mubr.msk.bf16.mxu0 %vm109_vm4, %v82_v23 }
  0x8b   :  { %v615_v26 = vsel %vm63_vm5, 1.0, %v776_v5  ;;  %v614_v27 = vsel %vm62_vm6, 1.0, %v776_v5  ;;  %673 = vmatmul.mubr.msk.bf16.vlgmr.msra.gmra.mrb[0].mxu0 %vm109_vm4, %v83_v22 }
  0x8c   :  { %v84_v28 = vpack.c.bf16 %v615_v26, %v614_v27  ;;  %697 = vmatpush3.bf16.msra.mxu0 %v860_v34 }
  0x8d   :  { %v57_v29 = vpop.permute.xlu1 %56  ;;  %v54_v30 = vpop.permute.xlu0 %53  ;;  %698 = vmatprep.subr.bf16.mxu0 %v776_v5 }
  0x8e   :  { %vm65_vm7 = vcmp.eq.s32.totalorder %v57_v29, %v33_v13  ;;  %vm64_vm8 = vcmp.eq.s32.totalorder %v54_v30, %v33_v13  ;;  %676 = vmatprep.mubr.msk.bf16.mxu0 %vm109_vm4, %v84_v28 }
  0x8f   :  { %v617_v31 = vsel %vm65_vm7, 1.0, %v776_v5  ;;  %v616_v32 = vsel %vm64_vm8, 1.0, %v776_v5 }
  0x90   :  { %v85_v33 = vpack.c.bf16 %v617_v31, %v616_v32  ;;  %699 = vmatpush3.bf16.msra.mxu0 %v869_v35 }
  0x91   :  { %712 = vmatprep.subr.bf16.mxu0 %v776_v5 }
  0x93   :  { %677 = vmatmul.mubr.msk.bf16.gmra.mrb[4].mxu0 %vm109_vm4, %v85_v33 }
  0x94   :  { %700 = vmatprep.mubr.msk.bf16.mxu0 %vm777_vm9, %v776_v5 }
 0x15e   :  { %v674_v37 = vpop.f32.mrb[0].mxu0 }
 0x15f   :  { %v165_v38 = vadd.f32 %v674_v37, %v618_v36  ;;  %v156_v39 = vpop.f32.mrb[1].mxu0 }
 0x160   :  { %v157_v40 = vadd.f32 %v618_v36, %v156_v39  ;;  %v675_v41 = vpop.f32.mrb[2].mxu0 }
 0x161   :  { %v168_v42 = vadd.f32 %v675_v41, %v618_v36  ;;  %v159_v43 = vpop.f32.mrb[3].mxu0 }
 0x162   :  { %755 = vtanh.f32 %v157_v40  ;;  %v160_v44 = vadd.f32 %v618_v36, %v159_v43 }
 0x166   :  { %v678_v45 = vpop.f32.mrb[4].mxu0 }
 0x167   :  { %v882_v46 = vadd.f32 %v678_v45, %v618_v36  ;;  %v172_v47 = vpop.f32.mrb[5].mxu0 }
 0x168   :  { %v173_v48 = vadd.f32 %v618_v36, %v172_v47  ;;  %v679_v49 = vpop.f32.mrb[6].mxu0 }
 0x169   :  { %v884_v50 = vadd.f32 %v679_v49, %v618_v36  ;;  %v175_v51 = vpop.f32.mrb[7].mxu0 }
 0x16a   :  { %v886_v52 = vadd.f32 %v618_v36, %v175_v51 }
 0x16c   :  { %v756_v53 = vpop.eup %755 }
 0x16d   :  { %v192_v54 = vpack.c.bf16 %v756_v53, %v756_v53 }
 0x16f   :  { %685 = vmatmul.mubr.msk.bf16.vlgmr.msra.gmra.mrb[0].mxu1 %vm109_vm4, %v192_v54 }
 0x170   :  { %689 = vmatpush3.bf16.msra.mxu1 %v860_v34  ;;  %692 = vmatprep.mubr.msk.bf16.mxu1 %vm777_vm9, %v776_v5 }
 0x171   :  { %690 = vmatprep.subr.bf16.mxu1 %v776_v5 }
 0x174   :  { %691 = vmatpush3.bf16.msra.mxu1 %v869_v35 }
 0x175   :  { %704 = vmatprep.subr.bf16.mxu1 %v776_v5 }
 0x242   :  { %v242_v55 = vpop.f32.mrb[0].mxu1 }
 0x243   :  { %v248_v56 = vadd.f32 %v242_v55, %v160_v44  ;;  %v686_v57 = vpop.f32.mrb[1].mxu1 }
 0x244   :  { %v245_v58 = vpop.f32.mrb[2].mxu1 }
 0x245   :  { %757 = vtanh.f32 %v248_v56  ;;  %v687_v59 = vpop.f32.mrb[3].mxu1 }
 0x24f   :  { %v758_v60 = vpop.eup %757 }
 0x250   :  { %v250_v61 = vpack.c.bf16 %v758_v60, %v758_v60 }
 0x252   :  { %693 = vmatmul.mubr.msk.bf16.vlgmr.msra.gmra.mrb[4].mxu1 %vm109_vm4, %v250_v61 }
 0x253   :  { %705 = vmatpush3.bf16.msra.mxu1 %v860_v34  ;;  %708 = vmatprep.mubr.msk.bf16.mxu1 %vm777_vm9, %v776_v5 }
 0x254   :  { %706 = vmatprep.subr.bf16.mxu1 %v776_v5 }
 0x257   :  { %707 = vmatpush3.bf16.msra.mxu1 %v869_v35 }
 0x258   :  { %720 = vmatprep.subr.bf16.mxu1 %v776_v5 }
 0x325   :  { %v288_v62 = vpop.f32.mrb[4].mxu1 }
 0x326   :  { %v294_v63 = vadd.f32 %v288_v62, %v165_v38  ;;  %v694_v0 = vpop.f32.mrb[5].mxu1 }
 0x327   :  { %v291_v1 = vpop.f32.mrb[6].mxu1 }
 0x328   :  { %759 = vtanh.f32 %v294_v63  ;;  %v695_v2 = vpop.f32.mrb[7].mxu1 }
 0x332   :  { %v760_v3 = vpop.eup %759 }
 0x333   :  { %v296_v4 = vpack.c.bf16 %v760_v3, %v760_v3 }
 0x335   :  { %701 = vmatmul.mubr.msk.bf16.vlgmr.msra.gmra.mrb[8].mxu0 %vm109_vm4, %v296_v4 }
 0x336   :  { %713 = vmatpush3.bf16.msra.mxu0 %v860_v34  ;;  %716 = vmatprep.mubr.msk.bf16.mxu0 %vm777_vm9, %v776_v5 }
 0x337   :  { %714 = vmatprep.subr.bf16.mxu0 %v776_v5 }
 0x33a   :  { %715 = vmatpush3.bf16.msra.mxu0 %v869_v35 }
 0x33b   :  { %728 = vmatprep.subr.bf16.mxu0 %v776_v5 }
 0x408   :  { %v334_v6 = vpop.f32.mrb[8].mxu0 }
 0x409   :  { %v340_v7 = vadd.f32 %v334_v6, %v168_v42  ;;  %v702_v8 = vpop.f32.mrb[9].mxu0 }
 0x40a   :  { %v337_v9 = vpop.f32.mrb[10].mxu0 }
 0x40b   :  { %761 = vtanh.f32 %v340_v7  ;;  %v703_v10 = vpop.f32.mrb[11].mxu0 }
 0x415   :  { %v762_v11 = vpop.eup %761 }
 0x416   :  { %v342_v12 = vpack.c.bf16 %v762_v11, %v762_v11 }
 0x418   :  { %709 = vmatmul.mubr.msk.bf16.vlgmr.msra.gmra.mrb[8].mxu1 %vm109_vm4, %v342_v12 }
 0x419   :  { %721 = vmatpush3.bf16.msra.mxu1 %v860_v34  ;;  %724 = vmatprep.mubr.msk.bf16.mxu1 %vm777_vm9, %v776_v5 }
 0x41a   :  { %722 = vmatprep.subr.bf16.mxu1 %v776_v5 }
 0x41d   :  { %723 = vmatpush3.bf16.msra.mxu1 %v869_v35 }
 0x41e   :  { %736 = vmatprep.subr.bf16.mxu1 %v776_v5 }
 0x4eb   :  { %v380_v13 = vpop.f32.mrb[8].mxu1 }
 0x4ec   :  { %v386_v14 = vadd.f32 %v380_v13, %v173_v48  ;;  %v710_v15 = vpop.f32.mrb[9].mxu1 }
 0x4ed   :  { %v383_v16 = vpop.f32.mrb[10].mxu1 }
 0x4ee   :  { %763 = vtanh.f32 %v386_v14  ;;  %v711_v17 = vpop.f32.mrb[11].mxu1 }
 0x4f8   :  { %v764_v18 = vpop.eup %763 }
 0x4f9   :  { %v388_v19 = vpack.c.bf16 %v764_v18, %v764_v18 }
 0x4fb   :  { %717 = vmatmul.mubr.msk.bf16.vlgmr.msra.gmra.mrb[12].mxu0 %vm109_vm4, %v388_v19 }
 0x4fc   :  { %729 = vmatpush3.bf16.msra.mxu0 %v860_v34  ;;  %732 = vmatprep.mubr.msk.bf16.mxu0 %vm777_vm9, %v776_v5  ;;  %v753_v34 = vld [vmem:[%s950_s4] sm:$0xff]  }
 0x4fd   :  { %730 = vmatprep.subr.bf16.mxu0 %v776_v5 }
 0x500   :  { %731 = vmatpush3.bf16.msra.mxu0 %v869_v35  ;;  %v754_v35 = vld [vmem:[%s950_s4 + $0x8] sm:$0xff]  }
 0x5ce   :  { %v426_v20 = vpop.f32.mrb[12].mxu0 }
 0x5cf   :  { %v432_v21 = vadd.f32 %v426_v20, %v886_v52  ;;  %v718_v22 = vpop.f32.mrb[13].mxu0 }
 0x5d0   :  { %v429_v23 = vpop.f32.mrb[14].mxu0 }
 0x5d1   :  { %765 = vtanh.f32 %v432_v21  ;;  %v719_v24 = vpop.f32.mrb[15].mxu0 }
 0x5db   :  { %v766_v25 = vpop.eup %765 }
 0x5dc   :  { %v434_v26 = vpack.c.bf16 %v766_v25, %v766_v25 }
 0x5de   :  { %725 = vmatmul.mubr.msk.bf16.vlgmr.msra.gmra.mrb[12].mxu1 %vm109_vm4, %v434_v26 }
 0x5df   :  { %740 = vmatprep.mubr.msk.bf16.mxu1 %vm777_vm9, %v776_v5  ;;  %737 = vmatpush3.bf16.msra.mxu1 %v753_v34 }
 0x5e0   :  { %738 = vmatprep.subr.bf16.mxu1 %v776_v5  ;;  %v634_v5 = vld [vmem:[%s951_s5] ss:$0 sm:$0xff] }
 0x5e3   :  { %739 = vmatpush3.bf16.msra.mxu1 %v754_v35 }
 0x6b1   :  { %v472_v27 = vpop.f32.mrb[12].mxu1 }
 0x6b2   :  { %v478_v28 = vadd.f32 %v472_v27, %v882_v46  ;;  %v726_v29 = vpop.f32.mrb[13].mxu1 }
 0x6b3   :  { %v475_v30 = vpop.f32.mrb[14].mxu1 }
 0x6b4   :  { %767 = vtanh.f32 %v478_v28  ;;  %v727_v31 = vpop.f32.mrb[15].mxu1 }
 0x6be   :  { %v768_v32 = vpop.eup %767 }
 0x6bf   :  { %v480_v33 = vpack.c.bf16 %v768_v32, %v768_v32 }
 0x6c1   :  { %733 = vmatmul.mubr.msk.bf16.vlgmr.msra.gmra.mrb[16].mxu0 %vm109_vm4, %v480_v33 }
 0x794   :  { %v518_v36 = vpop.f32.mrb[16].mxu0 }
 0x795   :  { %v524_v37 = vadd.f32 %v518_v36, %v884_v50  ;;  %v734_v38 = vpop.f32.mrb[17].mxu0 }
 0x796   :  { %v521_v39 = vpop.f32.mrb[18].mxu0 }
 0x797   :  { %769 = vtanh.f32 %v524_v37  ;;  %v735_v40 = vpop.f32.mrb[19].mxu0 }
 0x7a1   :  { %v770_v41 = vpop.eup %769 }
 0x7a2   :  { %v526_v42 = vpack.c.bf16 %v770_v41, %v770_v41 }
 0x7a4   :  { %741 = vmatmul.mubr.msk.bf16.vlgmr.msra.gmra.mrb[16].mxu1 %vm109_vm4, %v526_v42 }
 0x877   :  { %v587_v43 = vpop.f32.mrb[16].mxu1 }
 0x878   :  { %v588_v44 = vadd.f32 %v634_v5, %v587_v43  ;;  %v742_v45 = vpop.f32.mrb[17].mxu1 }
 0x879   :  { %v590_v46 = vpop.f32.mrb[18].mxu1 }
 0x87a   :  { %v743_v47 = vpop.f32.mrb[19].mxu1  ;;  %v594_v48 = vsel %vm593_vm10, %v588_v44, -inf }
 0x87b   :  { %595 = vmax.xlane.f32.xlu0 %v594_v48 }
 0x908   :  { %v596_v49 = vpop.xlane.xlu0 %595 }
 0x909   :  { %v597_v50 = vsub.f32 %v588_v44, %v596_v49 }
 0x90b   :  { %v598_v51 = vmul.f32 1.442695, %v597_v50 }
 0x90d   :  { %771 = vpow2.f32 %v598_v51 }
 0x917   :  { %v772_v52 = vpop.eup %771 }
 0x918   :  { %v600_v53 = vsel %vm593_vm10, %v772_v52, 0.0 }
 0x919   :  { %601 = vadd.xlane.f32.xlu1 %v600_v53 }
 0x9a6   :  { %v602_v54 = vpop.xlane.xlu1 %601 }
 0x9a7   :  { %773 = vrcp.f32 %v602_v54 }
 0x9b1   :  { %v774_v55 = vpop.eup %773 }
 0x9b2   :  { %v604_v56 = vmul.f32 %v774_v55, %v772_v52 }
 0x9b4   :  { %605 = vst.msk [vmem:[%s952_s6] sm:$0xff] %vm593_vm10, %v604_v56 }

</bundles_post_ra>
